<compile_context>
chip_gen: v5e
topology: v5e:2x2
jax: 0.10.0
libtpu: 0.0.40
codegen_flags: <defaults>
</compile_context>

<pallas_src>
import math

import jax
import jax.numpy as jnp
from jax.experimental import pallas as pl
from jax.experimental.pallas import tpu as pltpu


_TARGET_TILE_BYTES = 1 << 20      # ~1 MiB per tile buffer (per stream)
_FLOOR_TILE_BYTES = 512 << 10     # never shrink tiles below this for pipeline depth
_MIN_PIPELINE_STEPS = 8           # >= 8 grid steps -> >= 4 steps per v7x TensorCore


def _scale_kernel(x_ref, w_ref, o_ref):
    # x_ref: (T, W) streaming tile; w_ref: (1, W) resident weight row.
    # Promotion (e.g. bf16 * f32 -> f32) happens inside the kernel.
    o_ref[...] = (x_ref[...] * w_ref[...]).astype(o_ref.dtype)


def _round_down(v, m):
    return (v // m) * m


def _choose_tile_rows(rows, W, in_item, out_item):
    """Pick the row-tile height T (multiple of the packed-sublane height)."""
    # Sub-32-bit dtypes pack along sublanes: 8 rows (f32), 16 (bf16), 32 (int8).
    sub = 32 // min(in_item, out_item)
    budget_item = max(in_item, out_item)
    row_bytes = W * budget_item

    T = max(sub, _round_down(_TARGET_TILE_BYTES // row_bytes, sub))
    T = min(T, rows)

    # Deepen the software pipeline: aim for >= _MIN_PIPELINE_STEPS grid steps,
    # but keep each tile >= ~512 KiB (already ~85% of HBM roofline there).
    t_cap = _round_down(pl.cdiv(rows, _MIN_PIPELINE_STEPS), sub)
    t_floor = max(sub, _round_down(_FLOOR_TILE_BYTES // row_bytes, sub))
    if t_cap >= t_floor:
        T = min(T, t_cap)

    if T <= 0 or T >= rows:
        return rows  # tiny input: single full-extent block

    # v7x megacore: prefer an even grid count so both TensorCores get equal work.
    g = pl.cdiv(rows, T)
    if g > 2 and g % 2 == 1:
        T_alt = T - sub
        if T_alt >= max(sub, t_floor) and pl.cdiv(rows, T_alt) % 2 == 0:
            T = T_alt
    return T


def seasonal_adjustment_block(x, weight):
    """Equivalent of `x * weight` with weight of shape (C,) broadcast on the last axis."""
    C = x.shape[-1]
    assert weight.shape == (C,), f"weight must be ({C},), got {weight.shape}"

    out_dtype = jnp.result_type(x.dtype, weight.dtype)
    if jnp.dtype(out_dtype) == jnp.dtype(jnp.float64):
        out_dtype = jnp.float32  # TPUs handle f64 poorly; clamp to f32.
    in_item = jnp.dtype(x.dtype).itemsize
    out_item = jnp.dtype(out_dtype).itemsize

    orig_shape = x.shape
    N = x.size
    if N == 0:  # degenerate empty input
        return x.astype(out_dtype) * weight.astype(out_dtype)

    # --- choose a lane-dense width W (always a multiple of 128) ----------------
    budget_item = max(in_item, out_item)
    max_lane_dense_w = max(128, _round_down(_TARGET_TILE_BYTES // (8 * budget_item), 128))

    pad = 0
    if C % 128 == 0:
        W = C
    else:
        lcm = (C * 128) // math.gcd(C, 128)
        if N % lcm == 0 and lcm <= max_lane_dense_w:
            W = lcm                      # tile the weight row to a 128-multiple lane width
        else:
            pad = (-C) % 128             # pad channels once in the wrapper instead of
            W = C + pad                  # streaming the whole tensor via masked stores

    if pad:
        x_work = jnp.pad(x, [(0, 0)] * (x.ndim - 1) + [(0, pad)])
        w_work = jnp.pad(weight.astype(out_dtype), (0, pad))
        reps = 1
    else:
        x_work = x
        w_work = weight.astype(out_dtype)
        reps = W // C

    w_row = jnp.tile(w_work, reps).reshape(1, W)
    rows = x_work.size // W
    x2 = x_work.reshape(rows, W)

    # --- row-tile sizing --------------------------------------------------------
    T = _choose_tile_rows(rows, W, in_item, out_item)
    grid = (pl.cdiv(rows, T),)

    # VMEM footprint: double-buffered input + output tiles + resident weight row.
    footprint = 2 * T * W * in_item + 2 * T * W * out_item + W * out_item
    vmem_limit = None
    if footprint > 12 * 1024 * 1024:            # headroom vs 16 MiB scoped default (v5e)
        vmem_limit = min(2 * footprint, 32 * 1024 * 1024)  # within v7x scoped budget

    # Alias output onto the input buffer when dtypes match (no extra HBM alloc).
    alias = {0: 0} if jnp.dtype(out_dtype) == jnp.dtype(x.dtype) else {}

    out2 = pl.pallas_call(
        _scale_kernel,
        out_shape=jax.ShapeDtypeStruct((rows, W), out_dtype),
        grid_spec=pltpu.PrefetchScalarGridSpec(
            num_scalar_prefetch=0,
            grid=grid,
            in_specs=[
                pl.BlockSpec((T, W), lambda i: (i, 0)),   # streaming x tiles
                pl.BlockSpec((1, W), lambda i: (0, 0)),   # resident weight row
            ],
            out_specs=pl.BlockSpec((T, W), lambda i: (i, 0)),
        ),
        compiler_params=pltpu.CompilerParams(
            dimension_semantics=("parallel",),
            vmem_limit_bytes=vmem_limit,
        ),
        cost_estimate=pl.CostEstimate(
            flops=rows * W,
            transcendentals=0,
            bytes_accessed=rows * W * (in_item + out_item) + W * out_item,
        ),
        input_output_aliases=alias,
    )(x2, w_row)

    if pad:
        return out2.reshape(orig_shape[:-1] + (W,))[..., :C]
    return out2.reshape(orig_shape)


if __name__ == "__main__":
    key = jax.random.PRNGKey(0)
    kx, kx2, kx3, kx4 = jax.random.split(key, 4)

    # --- primary small test (module-consistent shapes) --------------------------
    B, L, C = 2, 8, 32
    x = jax.random.normal(kx, (B, L, C), dtype=jnp.float32)
    # nn.Parameter(torch.ones(in_channels)) -> (C,); use non-trivial values to
    # actually exercise the multiply.
    weight = jnp.ones((C,), dtype=jnp.float32) + 0.01 * jnp.arange(C, dtype=jnp.float32)

    out = seasonal_adjustment_block(x, weight)
    jax.block_until_ready(out)
    ref = x * weight
    assert out.shape == (B, L, C)
    assert out.dtype == ref.dtype
    assert jnp.allclose(out, ref, atol=1e-6, rtol=1e-6)

    # --- multi-step grid test (rows=8192, W=128 -> T=1024, grid=(8,)) -----------
    B2, L2, C2 = 4, 4096, 64
    x_big = jax.random.normal(kx2, (B2, L2, C2), dtype=jnp.float32)
    w_big = 1.0 + 0.001 * jnp.arange(C2, dtype=jnp.float32)
    out_big = seasonal_adjustment_block(x_big, w_big)
    jax.block_until_ready(out_big)
    assert jnp.allclose(out_big, x_big * w_big, atol=1e-6, rtol=1e-6)

    # --- mixed-dtype promotion test (bf16 x * f32 weight -> f32 out) ------------
    x_bf = jax.random.normal(kx3, (2, 256, 256), dtype=jnp.bfloat16)
    w_bf = 1.0 + 0.001 * jnp.arange(256, dtype=jnp.float32)
    out_bf = seasonal_adjustment_block(x_bf, w_bf)
    jax.block_until_ready(out_bf)
    ref_bf = x_bf * w_bf
    assert out_bf.dtype == ref_bf.dtype
    assert jnp.allclose(out_bf, ref_bf, atol=1e-6, rtol=1e-6)

    # --- channel-padding path test (C=50: no lcm fit -> pad to 128 lanes) -------
    x_pad = jax.random.normal(kx4, (2, 7, 50), dtype=jnp.float32)
    w_pad = 1.0 + 0.01 * jnp.arange(50, dtype=jnp.float32)
    out_pad = seasonal_adjustment_block(x_pad, w_pad)
    jax.block_until_ready(out_pad)
    assert out_pad.shape == (2, 7, 50)
    assert jnp.allclose(out_pad, x_pad * w_pad, atol=1e-6, rtol=1e-6)

    print("KERNEL_OK")
</pallas_src>

<mosaic_0001>
module attributes {stable_mosaic.version = 11 : i64} {
  func.func @_scale_kernel(%arg0: i32, %arg1: memref<4x128xf32, #tpu.memory_space<vmem>>, %arg2: memref<1x128xf32, #tpu.memory_space<vmem>>, %arg3: memref<4x128xf32, #tpu.memory_space<vmem>>) attributes {dimension_semantics = [#tpu.dimension_semantics<parallel>], iteration_bounds = array<i64: 1>, scalar_prefetch = 0 : i64, scratch_operands = 0 : i64, tpu.core_type = #tpu.core_type<tc>, window_params = [{transform_indices = @transform_0, window_bounds = array<i64: 4, 128>}, {pipeline_mode = #tpu.pipeline_mode<synchronous>, transform_indices = @transform_1, window_bounds = array<i64: 1, 128>}, {transform_indices = @transform_2, window_bounds = array<i64: 4, 128>}]} {
    %c0 = arith.constant 0 : index
    %c0_0 = arith.constant 0 : index
    %0 = vector.load %arg1[%c0, %c0_0] : memref<4x128xf32, #tpu.memory_space<vmem>>, vector<4x128xf32>
    %c0_1 = arith.constant 0 : index
    %c0_2 = arith.constant 0 : index
    %1 = vector.load %arg2[%c0_1, %c0_2] : memref<1x128xf32, #tpu.memory_space<vmem>>, vector<1x128xf32>
    %2 = vector.broadcast %1 : vector<1x128xf32> to vector<4x128xf32>
    %3 = arith.mulf %0, %2 : vector<4x128xf32>
    %c0_3 = arith.constant 0 : index
    %c0_4 = arith.constant 0 : index
    %4 = vector.load %arg3[%c0_3, %c0_4] : memref<4x128xf32, #tpu.memory_space<vmem>>, vector<4x128xf32>
    tpu.vector_store %arg3[%c0_3, %c0_4], %3 {strides = array<i32>} : memref<4x128xf32, #tpu.memory_space<vmem>>, vector<4x128xf32>,
    return
  }
  func.func @transform_0(%arg0: i32) -> (i32, i32) {
    %c0_i32 = arith.constant 0 : i32
    %c0_i32_0 = arith.constant 0 : i32
    return %arg0, %c0_i32 : i32, i32
  }
  func.func @transform_1(%arg0: i32) -> (i32, i32) {
    %c0_i32 = arith.constant 0 : i32
    %c0_i32_0 = arith.constant 0 : i32
    %c0_i32_1 = arith.constant 0 : i32
    return %c0_i32, %c0_i32_0 : i32, i32
  }
  func.func @transform_2(%arg0: i32) -> (i32, i32) {
    %c0_i32 = arith.constant 0 : i32
    %c0_i32_0 = arith.constant 0 : i32
    return %arg0, %c0_i32 : i32, i32
  }
}

</mosaic_0001>

<bundles_post_ra>
// kernel: tpu_custom_call.1
= control target key start
LH: loop header
LB: loop body
LE: loop exit
PB: predicated region body
PF: predicated region fallthrough
CT: control target
= control target key end

     0   :  { %7 = vsyncpa [#allocation3], 0  ;;  %s131_s0 = inlined_call_operand.hbm [shape: f32[4,128], index: 0, kind: input, shape index: {}, may-alias: {0,2}]   ;;  %s132_s1 = inlined_call_operand.vmem [shape: f32[1,128], index: 1, kind: input, shape index: {}]   ;;  %s133_s2 = inlined_call_operand.hbm [shape: f32[4,128], index: 2, kind: output, shape index: {}, may-alias: {0,2}]  }
   0x1   :  { %8 = vsyncpa [#allocation4], 0  ;;  %s14_s11 = sshll.u32 %s131_s0, 4  ;;  %s105_s12 = smov [#allocation2]   ;;  %s15_s11 = int_to_ptr.hbm [resolvable:$true] %s14_s11 }
   0x2   :  { %s16_s13 = sshll.u32 %s105_s12, 4  ;;  %s17_s13 = int_to_ptr.vmem [resolvable:$true] %s16_s13 }
   0x3   :  { %19 = dma.hbm_to_vmem [thread:$0]  %s15_s11, 64, %s17_s13, [#allocation3]  }
   0x4   :  { %101 = dma.done.wait [#allocation3], 64  }
   0x5   :  { %102 = vsyncadd [#allocation3], 4294967232  ;;  %s106_s14 = smov [#allocation5]   ;;  %s40_s18 = sshll.u32 %s133_s2, 4  ;;  %v26_v0 = vld [vmem:[#allocation2] sm:$0xf]  ;;  %s41_s18 = int_to_ptr.hbm [resolvable:$true] %s40_s18 }
   0x6   :  { %s38_s15 = sshll.u32 %s106_s14, 4  ;;  %v52_v1 = vld [vmem:[%s132_s1] ss:$0 sm:$0xff]  ;;  %s39_s15 = int_to_ptr.vmem [resolvable:$true] %s38_s15 }
   0x7   :  { %v31_v2 = vmul.f32 %v52_v1, %v26_v0 }
   0x9   :  { %32 = vst [vmem:[#allocation5] sm:$0xf] %v31_v2 }
   0xa   :  { %43 = dma.vmem_to_hbm [thread:$0]  %s39_s15, 64, %s41_s18, [#allocation4]  }
   0xb   :  { %103 = dma.done.wait [#allocation4], 64  }
   0xc   :  { %104 = vsyncadd [#allocation4], 4294967232 }
   0xd   :  { %48 = vsyncpa [#allocation3], 1 }
   0xe   :  { %49 = vsyncpa [#allocation4], 1 }

</bundles_post_ra>
